<compile_context>
chip_gen: v5e
topology: v5e:2x2
jax: 0.10.0
libtpu: 0.0.40
codegen_flags: <defaults>
</compile_context>

<pallas_src>
import math

import jax
import jax.numpy as jnp
from jax.experimental import pallas as pl
from jax.experimental.pallas import tpu as pltpu


# ----------------------------------------------------------------------------
# Kernel: fused 1x1-conv FFN + residual + LayerNorm over a tile of token rows
# ----------------------------------------------------------------------------
def ffn_kernel(x_ref, w1_ref, b1_ref, w2_ref, b2_ref, g_ref, b_ref, o_ref):
    x = x_ref[...]                                        # (TM, C) f32 (residual / LN input)
    xb = x.astype(jnp.bfloat16)

    # conv1 (1x1): h = relu(x @ W1 + b1)   -- bf16 MXU inputs, f32 accumulation
    h = jnp.dot(xb, w1_ref[...], preferred_element_type=jnp.float32) + b1_ref[...]
    h = jnp.maximum(h, 0.0)                               # (TM, FF) f32

    # conv2 (1x1): y = h @ W2 + b2
    y = jnp.dot(h.astype(jnp.bfloat16), w2_ref[...],
                preferred_element_type=jnp.float32) + b2_ref[...]   # (TM, C) f32

    # residual + LayerNorm over the channel (last) axis, biased variance, eps=1e-5
    z = y + x
    mean = jnp.mean(z, axis=-1, keepdims=True)
    var = jnp.mean(jnp.square(z - mean), axis=-1, keepdims=True)
    normed = (z - mean) * jax.lax.rsqrt(var + 1e-5)
    o_ref[...] = (g_ref[...] * normed + b_ref[...]).astype(o_ref.dtype)


# ----------------------------------------------------------------------------
# Hardware / tiling helpers
# ----------------------------------------------------------------------------
def _round_up(v, m):
    return (v + m - 1) // m * m


def _vmem_capacity_bytes():
    """Physical per-core VMEM; conservative 64 MiB (v7x) if unqueryable."""
    try:
        info = pltpu.get_tpu_info()
        for attr in ("vmem_capacity_bytes", "vmem_size_bytes", "vmem_bytes"):
            v = getattr(info, attr, None)
            if v:
                return int(v)
    except Exception:
        pass
    return 64 << 20


def _device_kind():
    try:
        return jax.devices()[0].device_kind.lower()
    except Exception:
        return ""


def _pick_tm(n_rows):
    """Row-tile size: 512 on v6e (128 MiB VMEM, 256-wide MXU), 256 otherwise
    (v7x 64 MiB VMEM / 256-wide MXU; v5e 128-wide MXU).  Keep >= 2 grid steps
    when possible so v7x's two TensorCores + pipelining stay busy."""
    kind = _device_kind()
    tm = 512 if "v6" in kind else 256
    tm = min(tm, _round_up(n_rows, 8))
    if n_rows > 8 and pl.cdiv(n_rows, tm) < 2:
        tm = _round_up(pl.cdiv(n_rows, 2), 8)
    return max(tm, 8)


# ----------------------------------------------------------------------------
# Wrapper
# ----------------------------------------------------------------------------
def poswise_ffn(x, params, *, tm=None, out_dtype=None):
    """x: (B, S, C) f32.  params holds bf16 weights (in, out layout) + f32 bias/LN.

    NOTE: PyTorch stores conv weights as (out, in, 1); params here keep the
    transposed (in, out) layout so the kernel computes x @ W.  Transpose when
    porting real checkpoints.
    """
    B, S, C = x.shape
    w1, b1 = params["w1"], params["b1"]
    w2, b2 = params["w2"], params["b2"]
    gamma, beta = params["gamma"], params["beta"]
    FF = w1.shape[1]
    if out_dtype is None:
        out_dtype = x.dtype
    out_bytes = jnp.dtype(out_dtype).itemsize

    # Flatten (B, S) -> token rows; no wrapper-side padding copy -- Pallas
    # handles the ragged final block (row-independent compute, see header).
    N = B * S
    if tm is None:
        tm = _pick_tm(N)
    grid = (pl.cdiv(N, tm),)
    xf = x.reshape(N, C).astype(jnp.float32)

    row_in_spec = pl.BlockSpec((tm, C), lambda i: (i, 0))
    row_out_spec = pl.BlockSpec((tm, C), lambda i: (i, 0))

    def wspec(shape):
        # Grid-invariant (weight / bias / LN) block: single-buffered -- the block
        # index never changes, so double-buffering only wastes VMEM.
        return pl.BlockSpec(shape, lambda i: (0,) * len(shape),
                            pipeline_mode=pl.Buffered(1))

    # VMEM budget: double-buffered IO row tiles, single-buffered weights,
    # biases/LN params, and in-kernel f32/bf16 temporaries -- plus headroom,
    # capped below the chip's physical VMEM (generation-aware).
    est = (2 * tm * C * 4                     # x tile (f32, 2-buffered)
           + 2 * tm * C * out_bytes           # out tile (2-buffered)
           + 2 * C * FF * 2                   # w1 + w2 (bf16, 1-buffered)
           + (FF + 3 * C) * 4                 # biases / LN params (f32)
           + tm * FF * (4 + 2)                # h f32 + h bf16
           + tm * C * (4 + 4 + 2))            # y, z f32 + xb bf16
    vmem_cap = max(_vmem_capacity_bytes() - (12 << 20), 32 << 20)
    vmem_limit = min(max(int(est * 1.25) + (8 << 20), 32 << 20), vmem_cap)

    out = pl.pallas_call(
        ffn_kernel,
        out_shape=jax.ShapeDtypeStruct((N, C), out_dtype),
        grid=grid,
        in_specs=[row_in_spec,
                  wspec((C, FF)), wspec((1, FF)),
                  wspec((FF, C)), wspec((1, C)),
                  wspec((1, C)), wspec((1, C))],
        out_specs=row_out_spec,
        compiler_params=pltpu.CompilerParams(
            dimension_semantics=("parallel",),
            vmem_limit_bytes=vmem_limit),
    )(xf, w1, b1, w2, b2, gamma, beta)

    return out.reshape(B, S, C)


# ----------------------------------------------------------------------------
# Pure-JAX f32 reference (for correctness check only)
# ----------------------------------------------------------------------------
def reference_ffn(x, w1, b1, w2, b2, gamma, beta, eps=1e-5):
    h = jnp.maximum(x @ w1 + b1, 0.0)
    z = h @ w2 + b2 + x
    mean = jnp.mean(z, axis=-1, keepdims=True)
    var = jnp.mean(jnp.square(z - mean), axis=-1, keepdims=True)
    return gamma * (z - mean) * jax.lax.rsqrt(var + eps) + beta


if __name__ == "__main__":
    key = jax.random.PRNGKey(0)
    kx, kp = jax.random.split(key)

    # Small test shapes: in_channels / FFN hidden scaled 2048 -> 256.
    B, S, C, FF = 2, 16, 256, 256
    x = jax.random.normal(kx, (B, S, C), jnp.float32)

    # PyTorch default Conv1d init: U(-1/sqrt(fan_in), 1/sqrt(fan_in)), k=1.
    k1, k2, k3, k4 = jax.random.split(kp, 4)
    bound1 = 1.0 / math.sqrt(C)
    bound2 = 1.0 / math.sqrt(FF)
    w1 = jax.random.uniform(k1, (C, FF), jnp.float32, -bound1, bound1)   # conv1.weight.T
    b1 = jax.random.uniform(k2, (1, FF), jnp.float32, -bound1, bound1)
    w2 = jax.random.uniform(k3, (FF, C), jnp.float32, -bound2, bound2)   # conv2.weight.T
    b2 = jax.random.uniform(k4, (1, C), jnp.float32, -bound2, bound2)
    gamma = jnp.ones((1, C), jnp.float32)                                # LayerNorm.weight
    beta = jnp.zeros((1, C), jnp.float32)                                # LayerNorm.bias

    params = {"w1": w1.astype(jnp.bfloat16), "b1": b1,
              "w2": w2.astype(jnp.bfloat16), "b2": b2,
              "gamma": gamma, "beta": beta}

    fwd = jax.jit(poswise_ffn)
    out = fwd(x, params)
    jax.block_until_ready(out)

    assert out.shape == (B, S, C), out.shape
    assert bool(jnp.all(jnp.isfinite(out)))

    ref = reference_ffn(x, w1, b1, w2, b2, gamma, beta)
    # bf16 MXU inputs with f32 accumulation; re-derive this tolerance at full
    # scale (C=FF=2048) since the K=2048 dot accumulates more bf16 error.
    max_err = float(jnp.max(jnp.abs(out - ref)))
    assert max_err < 0.12, f"max abs err vs f32 reference: {max_err}"

    print("KERNEL_OK")
</pallas_src>

<mosaic_0001>
module attributes {stable_mosaic.version = 11 : i64} {
  func.func @ffn_kernel(%arg0: i32, %arg1: memref<16x256xf32, #tpu.memory_space<vmem>>, %arg2: memref<256x256xbf16, #tpu.memory_space<vmem>>, %arg3: memref<1x256xf32, #tpu.memory_space<vmem>>, %arg4: memref<256x256xbf16, #tpu.memory_space<vmem>>, %arg5: memref<1x256xf32, #tpu.memory_space<vmem>>, %arg6: memref<1x256xf32, #tpu.memory_space<vmem>>, %arg7: memref<1x256xf32, #tpu.memory_space<vmem>>, %arg8: memref<16x256xf32, #tpu.memory_space<vmem>>) attributes {dimension_semantics = [#tpu.dimension_semantics<parallel>], iteration_bounds = array<i64: 2>, scalar_prefetch = 0 : i64, scratch_operands = 0 : i64, tpu.core_type = #tpu.core_type<tc>, window_params = [{transform_indices = @transform_0, window_bounds = array<i64: 16, 256>}, {pipeline_mode = #tpu.pipeline_mode<synchronous>, transform_indices = @transform_1, window_bounds = array<i64: 256, 256>}, {pipeline_mode = #tpu.pipeline_mode<synchronous>, transform_indices = @transform_2, window_bounds = array<i64: 1, 256>}, {pipeline_mode = #tpu.pipeline_mode<synchronous>, transform_indices = @transform_3, window_bounds = array<i64: 256, 256>}, {pipeline_mode = #tpu.pipeline_mode<synchronous>, transform_indices = @transform_4, window_bounds = array<i64: 1, 256>}, {pipeline_mode = #tpu.pipeline_mode<synchronous>, transform_indices = @transform_5, window_bounds = array<i64: 1, 256>}, {pipeline_mode = #tpu.pipeline_mode<synchronous>, transform_indices = @transform_6, window_bounds = array<i64: 1, 256>}, {transform_indices = @transform_7, window_bounds = array<i64: 16, 256>}]} {
    %c0 = arith.constant 0 : index
    %c0_0 = arith.constant 0 : index
    %0 = vector.load %arg1[%c0, %c0_0] : memref<16x256xf32, #tpu.memory_space<vmem>>, vector<16x256xf32>
    %1 = arith.truncf %0 : vector<16x256xf32> to vector<16x256xbf16>
    %c0_1 = arith.constant 0 : index
    %c0_2 = arith.constant 0 : index
    %2 = vector.load %arg2[%c0_1, %c0_2] : memref<256x256xbf16, #tpu.memory_space<vmem>>, vector<256x256xbf16>
    %cst = arith.constant dense<0.000000e+00> : vector<16x256xf32>
    %3 = tpu.matmul %1, %2, %cst {dimension_numbers = #tpu.dot_dimension_numbers<[1], [0], [0], [1], [0, 0, 1, 1], [], []>} : vector<16x256xbf16>, vector<256x256xbf16>, vector<16x256xf32> -> vector<16x256xf32>
    %c0_3 = arith.constant 0 : index
    %c0_4 = arith.constant 0 : index
    %4 = vector.load %arg3[%c0_3, %c0_4] : memref<1x256xf32, #tpu.memory_space<vmem>>, vector<1x256xf32>
    %5 = vector.broadcast %4 : vector<1x256xf32> to vector<16x256xf32>
    %6 = arith.addf %3, %5 : vector<16x256xf32>
    %cst_5 = arith.constant 0.000000e+00 : f32
    %7 = vector.broadcast %cst_5 : f32 to vector<16x256xf32>
    %8 = arith.maximumf %6, %7 : vector<16x256xf32>
    %9 = arith.truncf %8 : vector<16x256xf32> to vector<16x256xbf16>
    %c0_6 = arith.constant 0 : index
    %c0_7 = arith.constant 0 : index
    %10 = vector.load %arg4[%c0_6, %c0_7] : memref<256x256xbf16, #tpu.memory_space<vmem>>, vector<256x256xbf16>
    %cst_8 = arith.constant dense<0.000000e+00> : vector<16x256xf32>
    %11 = tpu.matmul %9, %10, %cst_8 {dimension_numbers = #tpu.dot_dimension_numbers<[1], [0], [0], [1], [0, 0, 1, 1], [], []>} : vector<16x256xbf16>, vector<256x256xbf16>, vector<16x256xf32> -> vector<16x256xf32>
    %c0_9 = arith.constant 0 : index
    %c0_10 = arith.constant 0 : index
    %12 = vector.load %arg5[%c0_9, %c0_10] : memref<1x256xf32, #tpu.memory_space<vmem>>, vector<1x256xf32>
    %13 = vector.broadcast %12 : vector<1x256xf32> to vector<16x256xf32>
    %14 = arith.addf %11, %13 : vector<16x256xf32>
    %15 = arith.addf %14, %0 : vector<16x256xf32>
    %cst_11 = arith.constant dense<0.000000e+00> : vector<16xf32>
    %16 = vector.multi_reduction <add>, %15, %cst_11 [1] : vector<16x256xf32> to vector<16xf32>
    %17 = vector.shape_cast %16 : vector<16xf32> to vector<16x1xf32>
    %cst_12 = arith.constant 2.560000e+02 : f32
    %18 = vector.broadcast %cst_12 : f32 to vector<16x1xf32>
    %19 = arith.divf %17, %18 : vector<16x1xf32>
    %20 = vector.broadcast %19 : vector<16x1xf32> to vector<16x256xf32>
    %21 = arith.subf %15, %20 : vector<16x256xf32>
    %22 = arith.mulf %21, %21 : vector<16x256xf32>
    %cst_13 = arith.constant dense<0.000000e+00> : vector<16xf32>
    %23 = vector.multi_reduction <add>, %22, %cst_13 [1] : vector<16x256xf32> to vector<16xf32>
    %24 = vector.shape_cast %23 : vector<16xf32> to vector<16x1xf32>
    %cst_14 = arith.constant 2.560000e+02 : f32
    %25 = vector.broadcast %cst_14 : f32 to vector<16x1xf32>
    %26 = arith.divf %24, %25 : vector<16x1xf32>
    %27 = vector.broadcast %19 : vector<16x1xf32> to vector<16x256xf32>
    %28 = arith.subf %15, %27 : vector<16x256xf32>
    %cst_15 = arith.constant 9.99999974E-6 : f32
    %29 = vector.broadcast %cst_15 : f32 to vector<16x1xf32>
    %30 = arith.addf %26, %29 : vector<16x1xf32>
    %31 = math.rsqrt %30 : vector<16x1xf32>
    %32 = vector.broadcast %31 : vector<16x1xf32> to vector<16x256xf32>
    %33 = arith.mulf %28, %32 : vector<16x256xf32>
    %c0_16 = arith.constant 0 : index
    %c0_17 = arith.constant 0 : index
    %34 = vector.load %arg6[%c0_16, %c0_17] : memref<1x256xf32, #tpu.memory_space<vmem>>, vector<1x256xf32>
    %35 = vector.broadcast %34 : vector<1x256xf32> to vector<16x256xf32>
    %36 = arith.mulf %35, %33 : vector<16x256xf32>
    %c0_18 = arith.constant 0 : index
    %c0_19 = arith.constant 0 : index
    %37 = vector.load %arg7[%c0_18, %c0_19] : memref<1x256xf32, #tpu.memory_space<vmem>>, vector<1x256xf32>
    %38 = vector.broadcast %37 : vector<1x256xf32> to vector<16x256xf32>
    %39 = arith.addf %36, %38 : vector<16x256xf32>
    %c0_20 = arith.constant 0 : index
    %c0_21 = arith.constant 0 : index
    %40 = vector.load %arg8[%c0_20, %c0_21] : memref<16x256xf32, #tpu.memory_space<vmem>>, vector<16x256xf32>
    tpu.vector_store %arg8[%c0_20, %c0_21], %39 {strides = array<i32>} : memref<16x256xf32, #tpu.memory_space<vmem>>, vector<16x256xf32>,
    return
  }
  func.func @transform_0(%arg0: i32) -> (i32, i32) {
    %c0_i32 = arith.constant 0 : i32
    %c0_i32_0 = arith.constant 0 : i32
    return %arg0, %c0_i32 : i32, i32
  }
  func.func @transform_1(%arg0: i32) -> (i32, i32) {
    %c0_i32 = arith.constant 0 : i32
    %c0_i32_0 = arith.constant 0 : i32
    %c0_i32_1 = arith.constant 0 : i32
    return %c0_i32, %c0_i32_0 : i32, i32
  }
  func.func @transform_2(%arg0: i32) -> (i32, i32) {
    %c0_i32 = arith.constant 0 : i32
    %c0_i32_0 = arith.constant 0 : i32
    %c0_i32_1 = arith.constant 0 : i32
    return %c0_i32, %c0_i32_0 : i32, i32
  }
  func.func @transform_3(%arg0: i32) -> (i32, i32) {
    %c0_i32 = arith.constant 0 : i32
    %c0_i32_0 = arith.constant 0 : i32
    %c0_i32_1 = arith.constant 0 : i32
    return %c0_i32, %c0_i32_0 : i32, i32
  }
  func.func @transform_4(%arg0: i32) -> (i32, i32) {
    %c0_i32 = arith.constant 0 : i32
    %c0_i32_0 = arith.constant 0 : i32
    %c0_i32_1 = arith.constant 0 : i32
    return %c0_i32, %c0_i32_0 : i32, i32
  }
  func.func @transform_5(%arg0: i32) -> (i32, i32) {
    %c0_i32 = arith.constant 0 : i32
    %c0_i32_0 = arith.constant 0 : i32
    %c0_i32_1 = arith.constant 0 : i32
    return %c0_i32, %c0_i32_0 : i32, i32
  }
  func.func @transform_6(%arg0: i32) -> (i32, i32) {
    %c0_i32 = arith.constant 0 : i32
    %c0_i32_0 = arith.constant 0 : i32
    %c0_i32_1 = arith.constant 0 : i32
    return %c0_i32, %c0_i32_0 : i32, i32
  }
  func.func @transform_7(%arg0: i32) -> (i32, i32) {
    %c0_i32 = arith.constant 0 : i32
    %c0_i32_0 = arith.constant 0 : i32
    return %arg0, %c0_i32 : i32, i32
  }
}

</mosaic_0001>

<bundles_post_ra>
// kernel: poswise_ffn.1
= control target key start
LH: loop header
LB: loop body
LE: loop exit
PB: predicated region body
PF: predicated region fallthrough
CT: control target
= control target key end

     0   :  { %s2017_s0 = inlined_call_operand.hbm [shape: f32[32,256], index: 0, kind: input, shape index: {}]   ;;  %s2018_s1 = inlined_call_operand.hbm [shape: bf16[256,256], index: 1, kind: input, shape index: {}]   ;;  %s2019_s2 = inlined_call_operand.hbm [shape: f32[1,256], index: 2, kind: input, shape index: {}]   ;;  %s2020_s3 = inlined_call_operand.hbm [shape: bf16[256,256], index: 3, kind: input, shape index: {}]   ;;  %s2021_s4 = inlined_call_operand.vmem [shape: f32[1,256], index: 4, kind: input, shape index: {}]   ;;  %s2022_s5 = inlined_call_operand.vmem [shape: f32[1,256], index: 5, kind: input, shape index: {}]   ;;  %s2023_s6 = inlined_call_operand.hbm [shape: f32[1,256], index: 6, kind: input, shape index: {}]   ;;  %s2024_s7 = inlined_call_operand.hbm [shape: f32[32,256], index: 7, kind: output, shape index: {}]  }
   0x1   :  { %2025 = sst [smem:[#allocation16_spill]] %s2018_s1 }
   0x2   :  { %12 = vsyncpa [#allocation3], 0 }
   0x3   :  { %14 = vsyncpa [#allocation3 + $0x1], 0 }
   0x4   :  { %15 = vsyncpa [#allocation6], 0 }
   0x5   :  { %16 = vsyncpa [#allocation9], 0 }
   0x6   :  { %17 = vsyncpa [#allocation4], 0 }
   0x7   :  { %19 = vsyncpa [#allocation4 + $0x1], 0  ;;  %s1822_s24 = smov 0   ;;  %s1824_s25 = smov 0  }
   0x8   :  { %s1826_s26 = smov 0   ;;  %s1828_s27 = smov 0  }
   0x9 LB: > { %s1843_s28 = sadd.s32 4294967295, %s1769_s27   ;;  %s1097_s29 = sadd.s32 4294967294, %s1769_s27   ;;  %s1769_s27 = sphi %s1828_s27, %s2037_s27   ;;  %s1765_s26 = sphi %s1826_s26, %s2036_s26   ;;  %s1761_s25 = sphi %s1824_s25, %s2035_s25   ;;  %s1757_s24 = sphi %s1822_s24, %s2034_s24  }
   0xa   : > { %p45_p0 = scmp.ne.s32.totalorder %s1761_s25, %s1757_s24  ;;  %p46_p1 = scmp.eq.s32.totalorder %s1843_s28, 0 }
   0xb   : > { %p195_p2 = scmp.eq.s32.totalorder %s1843_s28, 1  ;;  %p201_p3 = scmp.eq.s32.totalorder %s1097_s29, 1 }
   0xc   : > { %p1852_p4 = por %p46_p1, %p45_p0  ;;  %p1098_p5 = scmp.ge.s32.totalorder %s1769_s27, 1 }
   0xd   : > { %p1857_p6 = por %p201_p3, %p45_p0  ;;  %p208_p7 = scmp.lt.s32.totalorder %s1769_s27, 3 }
   0xe   : > { %s2028_s1 = sld [smem:[#allocation16_spill]]  ;;  %s1771_s13 = smov [#allocation5]  }
   0xf   : > { %p1865_p8 = pnand %p1098_p5, %p208_p7  ;;  %s221_s14 = sshll.u32 %s1771_s13, 4  ;;  %s222_s14 = int_to_ptr.vmem [resolvable:$true] %s221_s14 }
  0x10   : > { %s245_s18 = sshll.u32 %s2020_s3, 4  ;;  %s1772_s19 = smov 128   ;;  %s246_s18 = int_to_ptr.hbm [resolvable:$true] %s245_s18 }
  0x11   : > { %p1465_p9 = pneg %p1865_p8  ;;  %s1773_s20 = smov 8  }
  0x12   : > { %s1774_s21 = smov [#allocation8]   ;;  %s234_s9 = sshll.u32 %s2019_s2, 4  ;;  %s235_s9 = int_to_ptr.hbm [resolvable:$true] %s234_s9 }
  0x13   : > { %p1873_p10 = pnand %p1465_p9, %p46_p1  ;;  %s247_s22 = sshll.u32 %s1774_s21, 4  ;;  %s248_s22 = int_to_ptr.vmem [resolvable:$true] %s247_s22 }
  0x14   : > { %s219_s11 = sshll.u32 %s2028_s1, 4  ;;  %s1776_s17 = smov [#allocation10]   ;;  %s220_s11 = int_to_ptr.hbm [resolvable:$true] %s219_s11 }
  0x15   : > { %1468 = dma.hbm_to_vmem [thread:$0]  (!%p1873_p10), %s220_s11, 4096, %s222_s14, [#allocation6], %s1772_s19, %s1772_s19, %s1773_s20  }
  0x16   : > { %1474 = dma.hbm_to_vmem [thread:$0]  (!%p1873_p10), %s246_s18, 4096, %s248_s22, [#allocation9], %s1772_s19, %s1772_s19, %s1773_s20  }
  0x17   : > { %s266_s11 = sshll.u32 %s2023_s6, 4  ;;  %s1775_s14 = smov [#allocation7]   ;;  %s267_s11 = int_to_ptr.hbm [resolvable:$true] %s266_s11 }
  0x18   : > { %s236_s16 = sshll.u32 %s1775_s14, 4  ;;  %s268_s21 = sshll.u32 %s1776_s17, 4  ;;  %s237_s16 = int_to_ptr.vmem [resolvable:$true] %s236_s16  ;;  %s269_s21 = int_to_ptr.vmem [resolvable:$true] %s268_s21 }
  0x19   : > { %1471 = dma.hbm_to_vmem [thread:$0]  (!%p1873_p10), %s235_s9, 32, %s237_s16, [#allocation6]  }
  0x1a   : > { %1477 = dma.hbm_to_vmem [thread:$0]  (!%p1873_p10), %s267_s11, 32, %s269_s21, [#allocation9]  }
  0x1b   : > { %s1896_s18 = sadd.s32 1, %s1769_s27   ;;  %s32_s19 = sadd.s32 1, %s1765_s26 }
  0x1c   : > { %s29_s20 = ssub.s32 %s1769_s27, %s1896_s18  ;;  %p39_p12 = scmp.ne.s32.totalorder %s1765_s26, %s1761_s25 }
  0x1d   : > { %p30_p13 = scmp.eq.s32.totalorder %s29_s20, 0  ;;  %p40_p0 = scmp.eq.s32.totalorder %s1769_s27, 0 }
  0x1e   : > { %p1906_p3 = por %p195_p2, %p39_p12  ;;  %p1490_p5 = scmp.lt.s32.totalorder %s1769_s27, 2 }
  0x1f   : > { %s1912_s23 = scalar_select %p30_p13, %s1765_s26, %s32_s19  }
  0x20   : > { %p41_p7 = por %p40_p0, %p39_p12  ;;  %s279_s29 = sand.u32 1, %s1765_s26  }
  0x21   : > { %s1104_s15 = sshll.u32 %s279_s29, 5  ;;  %s1378_s9 = sshll.u32 %s1769_s27, 5 }
  0x22   : > { %s289_s11 = scalar_lea.hbm %s2017_s0, %s1378_s9  ;;  %s283_s14 = scalar_lea.vmem [#allocation2], %s1104_s15 }
  0x23   : > { %s292_s16 = sshll.u32 %s283_s14, 4  ;;  %s290_s17 = sshll.u32 %s289_s11, 4  ;;  %s293_s16 = int_to_ptr.vmem [resolvable:$true] %s292_s16  ;;  %s291_s17 = int_to_ptr.hbm [resolvable:$true] %s290_s17 }
  0x24   : > { %p1919_p2 = pnand %p1490_p5, %p41_p7  ;;  %s280_s19 = scalar_lea.sflag [#allocation3], %s279_s29 }
  0x25   : > { %s1665_s20 = sshra.s32 %s291_s17, 4  ;;  %s1672_s10 = scalar_lea.hbm %s2017_s0, 64  ;;  %s1666_s20 = int_to_ptr.hbm [resolvable:$true] %s1665_s20 }
  0x26   : > { %s1667_s1 = scalar_lea.hbm %s1666_s20, 32  ;;  %p1669_p10 = pneg %p1919_p2 }
  0x27   : > { %p1668_p9 = scmp.ne.s32.totalorder %s1666_s20, %s1667_s1  ;;  %p1673_p0 = scmp.lt.s32.totalorder %s1666_s20, %s2017_s0 }
  0x28   : > { %p1674_p5 = scmp.lt.s32.totalorder %s1672_s10, %s1667_s1 }
  0x29   : > { %p1670_p12 = pnand %p1669_p10, %p1668_p9 }
  0x2a   : > { %p1675_p7 = por %p1674_p5, %p1673_p0 }
  0x2b   : > { %p1671_p13 = pneg %p1670_p12 }
  0x2d   : > { %p1676_p11 = pnand %p1675_p7, %p1671_p13 }
  0x2f   : > { %1679 = shalt.err (!%p1676_p11)
}
  0x30   : > { %s1777_s29 = smov 256   ;;  %s1778_s14 = smov 16  }
  0x31   : > { %1481 = dma.hbm_to_vmem [thread:$0]  (!%p1919_p2), %s291_s17, 512, %s293_s16, %s280_s19, %s1777_s29, %s1777_s29, %s1778_s14  }
  0x32   : > { %304 = sbr.rel (%p1865_p8) target bundleno = 663 (0x297), region = 48  ;;  %s1936_s9 = sand.u32 (!%p1865_p8), 1, %s1761_s25  }
  0x33   : > { %s1109_s20 = sshll.u32 (!%p1865_p8), %s1936_s9, 5  ;;  %s307_s1 = scalar_lea.sflag (!%p1865_p8), [#allocation3], %s1936_s9 }
  0x34   : > { %s1942_s15 = scalar_lea.vmem (!%p1865_p8), [#allocation2], %s1109_s20 }
  0x37   : > { %1740 = dma.done.wait (%p1852_p4), %s307_s1, 512  }
  0x38   : > { %1742 = vsyncadd (%p1852_p4), %s307_s1, 4294966784 }
  0x39   : > { %1744 = dma.done.wait (%p46_p1), [#allocation6], 4128  }
  0x3a   : > { %1746 = vsyncadd (%p46_p1), [#allocation6], 4294963168 }
  0x3b   : > { %1748 = dma.done.wait (%p46_p1), [#allocation9], 4128  }
  0x3c   : > { %1750 = vsyncadd (%p46_p1), [#allocation9], 4294963168  ;;  %v1173_v0 = vld [vmem:[#allocation5 + $0x70] sm:$0xf]  ;;  %v1394_v1 = vld [vmem:[#allocation5 + $0x74] sm:$0xf0] }
  0x3d   : > { %v1237_v2 = vld [vmem:[#allocation5 + $0xf0] sm:$0xf]  ;;  %v1174_v3 = vor.u32 %v1394_v1, %v1173_v0  ;;  %v1410_v4 = vld [vmem:[#allocation5 + $0xf4] sm:$0xf0]  ;;  %v1393_v5 = vld [vmem:[#allocation5 + $0x74] sm:$0xf] }
  0x3e   : > { %v1175_v6 = vld [vmem:[#allocation5 + $0x78] sm:$0xf0]  ;;  %v1238_v7 = vor.u32 %v1410_v4, %v1237_v2  ;;  %v1409_v9 = vld [vmem:[#allocation5 + $0xf4] sm:$0xf]  ;;  %v1165_v11 = vld [vmem:[#allocation5 + $0x60] sm:$0xf] }
  0x3f   : > { %v1178_v8 = vor.u32 %v1393_v5, %v1175_v6  ;;  %v1239_v10 = vld [vmem:[#allocation5 + $0xf8] sm:$0xf0]  ;;  %568 = vmatpush.bf16.msra.mxu0 %v1174_v3  ;;  %v1392_v13 = vld [vmem:[#allocation5 + $0x64] sm:$0xf0]  ;;  %v1229_v14 = vld [vmem:[#allocation5 + $0xe0] sm:$0xf] }
  0x40   : > { %v1242_v12 = vor.u32 %v1409_v9, %v1239_v10  ;;  %v1408_v15 = vld [vmem:[#allocation5 + $0xe4] sm:$0xf0]  ;;  %582 = vmatpush.bf16.msra.mxu1 %v1238_v7  ;;  %v1166_v16 = vor.u32 %v1392_v13, %v1165_v11  ;;  %v1391_v18 = vld [vmem:[#allocation5 + $0x64] sm:$0xf]  ;;  %v1167_v19 = vld [vmem:[#allocation5 + $0x68] sm:$0xf0] }
  0x41   : > { %596 = vmatpush.bf16.msra.mxu2 %v1178_v8  ;;  %v1230_v17 = vor.u32 %v1408_v15, %v1229_v14  ;;  %v1407_v20 = vld [vmem:[#allocation5 + $0xe4] sm:$0xf]  ;;  %v1170_v21 = vor.u32 %v1391_v18, %v1167_v19  ;;  %v1231_v22 = vld [vmem:[#allocation5 + $0xe8] sm:$0xf0]  ;;  %v1157_v23 = vld [vmem:[#allocation5 + $0x50] sm:$0xf] }
  0x42   : > { %610 = vmatpush.bf16.msra.mxu3 %v1242_v12  ;;  %v1390_v24 = vld [vmem:[#allocation5 + $0x54] sm:$0xf0]  ;;  %v1234_v25 = vor.u32 %v1407_v20, %v1231_v22  ;;  %v1221_v26 = vld [vmem:[#allocation5 + $0xd0] sm:$0xf]  ;;  %v1389_v28 = vld [vmem:[#allocation5 + $0x54] sm:$0xf] }
  0x43   : > { %v1406_v27 = vld [vmem:[#allocation5 + $0xd4] sm:$0xf0]  ;;  %569 = vmatpush.bf16.msra.mxu0 %v1166_v16  ;;  %v1158_v29 = vor.u32 %v1390_v24, %v1157_v23  ;;  %v1159_v30 = vld [vmem:[#allocation5 + $0x58] sm:$0xf0]  ;;  %v1405_v31 = vld [vmem:[#allocation5 + $0xd4] sm:$0xf] }
  0x44   : > { %v1223_v32 = vld [vmem:[#allocation5 + $0xd8] sm:$0xf0]  ;;  %583 = vmatpush.bf16.msra.mxu1 %v1230_v17  ;;  %v1222_v33 = vor.u32 %v1406_v27, %v1221_v26  ;;  %v1162_v34 = vor.u32 %v1389_v28, %v1159_v30  ;;  %v1149_v35 = vld [vmem:[#allocation5 + $0x40] sm:$0xf]  ;;  %v1388_v36 = vld [vmem:[#allocation5 + $0x44] sm:$0xf0] }
  0x45   : > { %597 = vmatpush.bf16.msra.mxu2 %v1170_v21  ;;  %v1213_v37 = vld [vmem:[#allocation5 + $0xc0] sm:$0xf]  ;;  %v1226_v38 = vor.u32 %v1405_v31, %v1223_v32  ;;  %v1404_v39 = vld [vmem:[#allocation5 + $0xc4] sm:$0xf0]  ;;  %v1387_v40 = vld [vmem:[#allocation5 + $0x44] sm:$0xf]  ;;  %v1150_v44 = vor.u32 %v1388_v36, %v1149_v35 }
  0x46   : > { %611 = vmatpush.bf16.msra.mxu3 %v1234_v25  ;;  %v1151_v41 = vld [vmem:[#allocation5 + $0x48] sm:$0xf0]  ;;  %v1403_v42 = vld [vmem:[#allocation5 + $0xc4] sm:$0xf]  ;;  %v1214_v45 = vor.u32 %v1404_v39, %v1213_v37  ;;  %v1141_v47 = vld [vmem:[#allocation5 + $0x30] sm:$0xf] }
  0x47   : > { %v1215_v43 = vld [vmem:[#allocation5 + $0xc8] sm:$0xf0]  ;;  %570 = vmatpush.bf16.msra.mxu0 %v1158_v29  ;;  %v1154_v46 = vor.u32 %v1387_v40, %v1151_v41  ;;  %v1386_v48 = vld [vmem:[#allocation5 + $0x34] sm:$0xf0]  ;;  %v1205_v49 = vld [vmem:[#allocation5 + $0xb0] sm:$0xf] }
  0x48   : > { %584 = vmatpush.bf16.msra.mxu1 %v1222_v33  ;;  %v1218_v50 = vor.u32 %v1403_v42, %v1215_v43  ;;  %v1402_v51 = vld [vmem:[#allocation5 + $0xb4] sm:$0xf0]  ;;  %v1385_v52 = vld [vmem:[#allocation5 + $0x34] sm:$0xf]  ;;  %v1143_v53 = vld [vmem:[#allocation5 + $0x38] sm:$0xf0]  ;;  %v1142_v56 = vor.u32 %v1386_v48, %v1141_v47 }
  0x49   : > { %598 = vmatpush.bf16.msra.mxu2 %v1162_v34  ;;  %v1401_v54 = vld [vmem:[#allocation5 + $0xb4] sm:$0xf]  ;;  %v1207_v55 = vld [vmem:[#allocation5 + $0xb8] sm:$0xf0]  ;;  %v1206_v57 = vor.u32 %v1402_v51, %v1205_v49  ;;  %v1146_v58 = vor.u32 %v1385_v52, %v1143_v53  ;;  %v1133_v59 = vld [vmem:[#allocation5 + $0x20] sm:$0xf] }
  0x4a   : > { %612 = vmatpush.bf16.msra.mxu3 %v1226_v38  ;;  %v1384_v60 = vld [vmem:[#allocation5 + $0x24] sm:$0xf0]  ;;  %v1197_v61 = vld [vmem:[#allocation5 + $0xa0] sm:$0xf]  ;;  %v1210_v62 = vor.u32 %v1401_v54, %v1207_v55  ;;  %v1383_v0 = vld [vmem:[#allocation5 + $0x24] sm:$0xf] }
  0x4b   : > { %571 = vmatpush.bf16.msra.mxu0 %v1150_v44  ;;  %v1400_v63 = vld [vmem:[#allocation5 + $0xa4] sm:$0xf0]  ;;  %v1135_v1 = vld [vmem:[#allocation5 + $0x28] sm:$0xf0]  ;;  %v1399_v2 = vld [vmem:[#allocation5 + $0xa4] sm:$0xf]  ;;  %v1134_v4 = vor.u32 %v1384_v60, %v1133_v59 }
  0x4c   : > { %585 = vmatpush.bf16.msra.mxu1 %v1214_v45  ;;  %v1199_v3 = vld [vmem:[#allocation5 + $0xa8] sm:$0xf0]  ;;  %v1198_v5 = vor.u32 %v1400_v63, %v1197_v61  ;;  %v1138_v6 = vor.u32 %v1383_v0, %v1135_v1  ;;  %v1125_v7 = vld [vmem:[#allocation5 + $0x10] sm:$0xf]  ;;  %v1382_v8 = vld [vmem:[#allocation5 + $0x14] sm:$0xf0] }
  0x4d   : > { %599 = vmatpush.bf16.msra.mxu2 %v1154_v46  ;;  %v1189_v9 = vld [vmem:[#allocation5 + $0x90] sm:$0xf]  ;;  %v1202_v10 = vor.u32 %v1399_v2, %v1199_v3  ;;  %v1398_v11 = vld [vmem:[#allocation5 + $0x94] sm:$0xf0]  ;;  %v1381_v12 = vld [vmem:[#allocation5 + $0x14] sm:$0xf]  ;;  %v1126_v16 = vor.u32 %v1382_v8, %v1125_v7 }
  0x4e   : > { %613 = vmatpush.bf16.msra.mxu3 %v1218_v50  ;;  %v1127_v13 = vld [vmem:[#allocation5 + $0x18] sm:$0xf0]  ;;  %v1397_v14 = vld [vmem:[#allocation5 + $0x94] sm:$0xf]  ;;  %v1117_v17 = vld [vmem:[#allocation5] sm:$0xf]  ;;  %v1190_v19 = vor.u32 %v1398_v11, %v1189_v9 }
  0x4f   : > { %572 = vmatpush.bf16.msra.mxu0 %v1142_v56  ;;  %v1191_v15 = vld [vmem:[#allocation5 + $0x98] sm:$0xf0]  ;;  %v1380_v18 = vld [vmem:[#allocation5 + $0x4] sm:$0xf0]  ;;  %v1130_v20 = vor.u32 %v1381_v12, %v1127_v13  ;;  %v1181_v21 = vld [vmem:[#allocation5 + $0x80] sm:$0xf] }
  0x50   : > { %586 = vmatpush.bf16.msra.mxu1 %v1206_v57  ;;  %v1396_v22 = vld [vmem:[#allocation5 + $0x84] sm:$0xf0]  ;;  %v1379_v23 = vld [vmem:[#allocation5 + $0x4] sm:$0xf]  ;;  %v1194_v24 = vor.u32 %v1397_v14, %v1191_v15  ;;  %v1119_v25 = vld [vmem:[#allocation5 + $0x8] sm:$0xf0]  ;;  %v1118_v31 = vor.u32 %v1380_v18, %v1117_v17 }
  0x51   : > { %600 = vmatpush.bf16.msra.mxu2 %v1146_v58  ;;  %v1395_v26 = vld [vmem:[#allocation5 + $0x84] sm:$0xf]  ;;  %v1183_v27 = vld [vmem:[#allocation5 + $0x88] sm:$0xf0]  ;;  %v1301_v29 = vld [vmem:[#allocation8 + $0x70] sm:$0xf]  ;;  %v1182_v35 = vor.u32 %v1396_v22, %v1181_v21  ;;  %v1122_v36 = vor.u32 %v1379_v23, %v1119_v25 }
  0x52   : > { %614 = vmatpush.bf16.msra.mxu3 %v1210_v62  ;;  %v1957_v28 = vld [vmem:[%s1942_s15] sm:$0xff]  ;;  %v1426_v30 = vld [vmem:[#allocation8 + $0x74] sm:$0xf0]  ;;  %v1960_v32 = vld [vmem:[%s1942_s15 + $0x10] sm:$0xff]  ;;  %v1186_v39 = vor.u32 %v1395_v26, %v1183_v27  ;;  %s1444_s21 = sshll.u32 %s1843_s28, 5  ;;  %s361_s19 = scalar_lea.vmem [#allocation11], %s1109_s20 }
  0x53   : > { %573 = vmatpush.bf16.msra.mxu0 %v1134_v4  ;;  %v1425_v33 = vld [vmem:[#allocation8 + $0x74] sm:$0xf]  ;;  %v1303_v34 = vld [vmem:[#allocation8 + $0x78] sm:$0xf0]  ;;  %v1963_v37 = vld [vmem:[%s1942_s15 + $0x8] sm:$0xff]  ;;  %v1302_v40 = vor.u32 %v1426_v30, %v1301_v29  ;;  %v368_v44 = vpack.c.bf16 %v1960_v32, %v1957_v28  ;;  %s982_s11 = scalar_lea.hbm %s2024_s7, %s1444_s21  ;;  %s983_s29 = sshll.u32 %s361_s19, 4  ;;  %s984_s29 = int_to_ptr.vmem [resolvable:$true] %s983_s29 }
  0x54   : > { %587 = vmatpush.bf16.msra.mxu1 %v1198_v5  ;;  %v1966_v38 = vld [vmem:[%s1942_s15 + $0x18] sm:$0xff]  ;;  %v1293_v41 = vld [vmem:[#allocation8 + $0x60] sm:$0xf]  ;;  %v1365_v42 = vld [vmem:[#allocation8 + $0xf0] sm:$0xf]  ;;  %v1306_v45 = vor.u32 %v1425_v33, %v1303_v34  ;;  %s985_s28 = sshll.u32 %s982_s11, 4  ;;  %s986_s28 = int_to_ptr.hbm [resolvable:$true] %s985_s28 }
  0x55   : > { %601 = vmatpush.bf16.msra.mxu2 %v1138_v6  ;;  %v1442_v43 = vld [vmem:[#allocation8 + $0xf4] sm:$0xf0]  ;;  %v1424_v46 = vld [vmem:[#allocation8 + $0x64] sm:$0xf0]  ;;  %v1441_v47 = vld [vmem:[#allocation8 + $0xf4] sm:$0xf]  ;;  %v369_v49 = vpack.c.bf16 %v1966_v38, %v1963_v37 }
  0x56   : > { %615 = vmatpush.bf16.msra.mxu3 %v1202_v10  ;;  %v1367_v48 = vld [vmem:[#allocation8 + $0xf8] sm:$0xf0]  ;;  %v1423_v50 = vld [vmem:[#allocation8 + $0x64] sm:$0xf]  ;;  %v1295_v51 = vld [vmem:[#allocation8 + $0x68] sm:$0xf0]  ;;  %v1366_v52 = vor.u32 %v1442_v43, %v1365_v42  ;;  %v1294_v53 = vor.u32 %v1424_v46, %v1293_v41 }
  0x57   : > { %574 = vmatpush.bf16.msra.mxu0 %v1126_v16  ;;  %v1370_v54 = vor.u32 %v1441_v47, %v1367_v48  ;;  %v1285_v55 = vld [vmem:[#allocation8 + $0x50] sm:$0xf]  ;;  %v1357_v56 = vld [vmem:[#allocation8 + $0xe0] sm:$0xf]  ;;  %v1440_v57 = vld [vmem:[#allocation8 + $0xe4] sm:$0xf0]  ;;  %v1298_v58 = vor.u32 %v1423_v50, %v1295_v51 }
  0x58   : > { %588 = vmatpush.bf16.msra.mxu1 %v1190_v19  ;;  %v1422_v59 = vld [vmem:[#allocation8 + $0x54] sm:$0xf0]  ;;  %v1439_v60 = vld [vmem:[#allocation8 + $0xe4] sm:$0xf]  ;;  %v1359_v61 = vld [vmem:[#allocation8 + $0xe8] sm:$0xf0]  ;;  %v1358_v0 = vor.u32 %v1440_v57, %v1357_v56 }
  0x59   : > { %602 = vmatpush.bf16.msra.mxu2 %v1130_v20  ;;  %v1421_v62 = vld [vmem:[#allocation8 + $0x54] sm:$0xf]  ;;  %v1287_v63 = vld [vmem:[#allocation8 + $0x58] sm:$0xf0]  ;;  %v1286_v1 = vor.u32 %v1422_v59, %v1285_v55  ;;  %v1362_v2 = vor.u32 %v1439_v60, %v1359_v61  ;;  %v1277_v4 = vld [vmem:[#allocation8 + $0x40] sm:$0xf] }
  0x5a   : > { %616 = vmatpush.bf16.msra.mxu3 %v1194_v24  ;;  %v1290_v3 = vor.u32 %v1421_v62, %v1287_v63  ;;  %v1420_v5 = vld [vmem:[#allocation8 + $0x44] sm:$0xf0]  ;;  %v1419_v6 = vld [vmem:[#allocation8 + $0x44] sm:$0xf]  ;;  %v1279_v7 = vld [vmem:[#allocation8 + $0x48] sm:$0xf0] }
  0x5b   : > { %575 = vmatpush.bf16.msra.mxu0 %v1118_v31  ;;  %v1278_v8 = vor.u32 %v1420_v5, %v1277_v4  ;;  %v1282_v9 = vor.u32 %v1419_v6, %v1279_v7  ;;  %v1349_v10 = vld [vmem:[#allocation8 + $0xd0] sm:$0xf]  ;;  %v1438_v11 = vld [vmem:[#allocation8 + $0xd4] sm:$0xf0]  ;;  %v1437_v12 = vld [vmem:[#allocation8 + $0xd4] sm:$0xf] }
  0x5c   : > { %589 = vmatpush.bf16.msra.mxu1 %v1182_v35  ;;  %v1350_v13 = vor.u32 %v1438_v11, %v1349_v10  ;;  %v1351_v14 = vld [vmem:[#allocation8 + $0xd8] sm:$0xf0]  ;;  %v1269_v16 = vld [vmem:[#allocation8 + $0x30] sm:$0xf]  ;;  %v1418_v17 = vld [vmem:[#allocation8 + $0x34] sm:$0xf0] }
  0x5d   : > { %603 = vmatpush.bf16.msra.mxu2 %v1122_v36  ;;  %v1354_v15 = vor.u32 %v1437_v12, %v1351_v14  ;;  %v1417_v18 = vld [vmem:[#allocation8 + $0x34] sm:$0xf]  ;;  %v1270_v19 = vor.u32 %v1418_v17, %v1269_v16  ;;  %v1271_v20 = vld [vmem:[#allocation8 + $0x38] sm:$0xf0]  ;;  %v1341_v22 = vld [vmem:[#allocation8 + $0xc0] sm:$0xf] }
  0x5e   : > { %617 = vmatpush.bf16.msra.mxu3 %v1186_v39  ;;  %576 = vmatmul.bf16.vlgmr.msra.gmra.mxu0 %v368_v44  ;;  %v1274_v21 = vor.u32 %v1417_v18, %v1271_v20  ;;  %v1436_v23 = vld [vmem:[#allocation8 + $0xc4] sm:$0xf0]  ;;  %v1435_v24 = vld [vmem:[#allocation8 + $0xc4] sm:$0xf]  ;;  %v1343_v26 = vld [vmem:[#allocation8 + $0xc8] sm:$0xf0] }
  0x5f   : > { %828 = vmatpush.bf16.msrb.mxu0 %v1302_v40  ;;  %590 = vmatmul.bf16.vlgmr.msra.gmra.mxu1 %v369_v49  ;;  %v1342_v25 = vor.u32 %v1436_v23, %v1341_v22  ;;  %v1346_v27 = vor.u32 %v1435_v24, %v1343_v26  ;;  %v1261_v29 = vld [vmem:[#allocation8 + $0x20] sm:$0xf]  ;;  %v1416_v30 = vld [vmem:[#allocation8 + $0x24] sm:$0xf0]  ;;  %v1415_v33 = vld [vmem:[#allocation8 + $0x24] sm:$0xf] }
  0x60   : > { %604 = vmatmul.bf16.vlgmr.msra.gmra.mxu2 %v368_v44  ;;  %842 = vmatpush.bf16.msrb.mxu1 %v1366_v52  ;;  %v1262_v31 = vor.u32 %v1416_v30, %v1261_v29  ;;  %v1263_v34 = vld [vmem:[#allocation8 + $0x28] sm:$0xf0]  ;;  %v1333_v36 = vld [vmem:[#allocation8 + $0xb0] sm:$0xf]  ;;  %v1434_v39 = vld [vmem:[#allocation8 + $0xb4] sm:$0xf0] }
  0x61   : > { %856 = vmatpush.bf16.msrb.mxu2 %v1306_v45  ;;  %618 = vmatmul.bf16.vlgmr.msra.gmra.mxu3 %v369_v49  ;;  %v1266_v35 = vor.u32 %v1415_v33, %v1263_v34  ;;  %v1433_v40 = vld [vmem:[#allocation8 + $0xb4] sm:$0xf]  ;;  %v1334_v41 = vor.u32 %v1434_v39, %v1333_v36  ;;  %v1335_v42 = vld [vmem:[#allocation8 + $0xb8] sm:$0xf0]  ;;  %v1253_v44 = vld [vmem:[#allocation8 + $0x10] sm:$0xf] }
  0x62   : > { %870 = vmatpush.bf16.msrb.mxu3 %v1370_v54  ;;  %v1338_v43 = vor.u32 %v1433_v40, %v1335_v42  ;;  %v1414_v45 = vld [vmem:[#allocation8 + $0x14] sm:$0xf0]  ;;  %v1413_v46 = vld [vmem:[#allocation8 + $0x14] sm:$0xf]  ;;  %v1255_v48 = vld [vmem:[#allocation8 + $0x18] sm:$0xf0] }
  0x63   : > { %829 = vmatpush.bf16.msrb.mxu0 %v1294_v53  ;;  %v1254_v47 = vor.u32 %v1414_v45, %v1253_v44  ;;  %v1258_v49 = vor.u32 %v1413_v46, %v1255_v48  ;;  %v1325_v50 = vld [vmem:[#allocation8 + $0xa0] sm:$0xf]  ;;  %v1432_v51 = vld [vmem:[#allocation8 + $0xa4] sm:$0xf0]  ;;  %v1431_v52 = vld [vmem:[#allocation8 + $0xa4] sm:$0xf] }
  0x64   : > { %843 = vmatpush.bf16.msrb.mxu1 %v1358_v0  ;;  %v1326_v53 = vor.u32 %v1432_v51, %v1325_v50  ;;  %v1327_v54 = vld [vmem:[#allocation8 + $0xa8] sm:$0xf0]  ;;  %v1245_v56 = vld [vmem:[#allocation8] sm:$0xf]  ;;  %v1412_v57 = vld [vmem:[#allocation8 + $0x4] sm:$0xf0] }
  0x65   : > { %857 = vmatpush.bf16.msrb.mxu2 %v1298_v58  ;;  %v1330_v55 = vor.u32 %v1431_v52, %v1327_v54  ;;  %v1411_v58 = vld [vmem:[#allocation8 + $0x4] sm:$0xf]  ;;  %v1246_v59 = vor.u32 %v1412_v57, %v1245_v56  ;;  %v1247_v60 = vld [vmem:[#allocation8 + $0x8] sm:$0xf0]  ;;  %v1317_v62 = vld [vmem:[#allocation8 + $0x90] sm:$0xf] }
  0x66   : > { %871 = vmatpush.bf16.msrb.mxu3 %v1362_v2  ;;  %v1250_v61 = vor.u32 %v1411_v58, %v1247_v60  ;;  %v1430_v63 = vld [vmem:[#allocation8 + $0x94] sm:$0xf0]  ;;  %v1429_v0 = vld [vmem:[#allocation8 + $0x94] sm:$0xf]  ;;  %v1319_v2 = vld [vmem:[#allocation8 + $0x98] sm:$0xf0] }
  0x67   : > { %830 = vmatpush.bf16.msrb.mxu0 %v1286_v1  ;;  %v1318_v1 = vor.u32 %v1430_v63, %v1317_v62  ;;  %v1309_v4 = vld [vmem:[#allocation8 + $0x80] sm:$0xf]  ;;  %v1428_v5 = vld [vmem:[#allocation8 + $0x84] sm:$0xf0]  ;;  %v1427_v6 = vld [vmem:[#allocation8 + $0x84] sm:$0xf] }
  0x68   : > { %844 = vmatpush.bf16.msrb.mxu1 %v1350_v13  ;;  %v1310_v7 = vor.u32 %v1428_v5, %v1309_v4  ;;  %v402_v10 = vld [vmem:[#allocation7] sm:$0x3]  ;;  %s970_s14 = scalar_lea.sflag [#allocation4], %s1936_s9  ;;  %s1709_s20 = sshra.s32 %s986_s28, 4  ;;  %s1710_s20 = int_to_ptr.hbm [resolvable:$true] %s1709_s20 }
  0x69   : > { %858 = vmatpush.bf16.msrb.mxu2 %v1290_v3  ;;  %v1322_v3 = vor.u32 %v1429_v0, %v1319_v2  ;;  %v404_v12 = vperm.slane %v402_v10, 0  ;;  %v405_v16 = vperm.slane %v402_v10, 1  ;;  %v662_v39 = vld [vmem:[%s2021_s4] sm:$0x3]  ;;  %v1779_v0 = vmov 256.0   ;;  %s1711_s1 = scalar_lea.hbm %s1710_s20, 32  ;;  %p1716_p11 = scmp.lt.s32.totalorder %s1710_s20, %s2024_s7 }
  0x6a   : > { %872 = vmatpush.bf16.msrb.mxu3 %v1354_v15  ;;  %v665_v44 = vperm.slane %v662_v39, 1  ;;  %1539 = vrcp.f32 %v1779_v0  ;;  %p1712_p1 = scmp.ne.s32.totalorder %s1710_s20, %s1711_s1  ;;  %s1715_s12 = scalar_lea.hbm %s2024_s7, 64 }
  0x6b   : > { %831 = vmatpush.bf16.msrb.mxu0 %v1278_v8  ;;  %v1311_v8 = vld [vmem:[#allocation8 + $0x88] sm:$0xf0]  ;;  %p1717_p2 = scmp.lt.s32.totalorder %s1715_s12, %s1711_s1 }
  0x6c   : > { %845 = vmatpush.bf16.msrb.mxu1 %v1342_v25  ;;  %p1713_p4 = pnand %p1712_p1, %p1906_p3 }
  0x6d   : > { %859 = vmatpush.bf16.msrb.mxu2 %v1282_v9  ;;  %v1314_v9 = vor.u32 %v1427_v6, %v1311_v8  ;;  %p1718_p9 = por %p1717_p2, %p1716_p11 }
  0x6e   : > { %873 = vmatpush.bf16.msrb.mxu3 %v1346_v27  ;;  %p1714_p8 = pneg %p1713_p4 }
  0x6f   : > { %832 = vmatpush.bf16.msrb.mxu0 %v1270_v19 }
  0x70   : > { %846 = vmatpush.bf16.msrb.mxu1 %v1334_v41  ;;  %v664_v41 = vperm.slane %v662_v39, 0  ;;  %p1719_p10 = pnand %p1718_p9, %p1714_p8 }
  0x71   : > { %860 = vmatpush.bf16.msrb.mxu2 %v1274_v21 }
  0x72   : > { %874 = vmatpush.bf16.msrb.mxu3 %v1338_v43 }
  0x73   : > { %833 = vmatpush.bf16.msrb.mxu0 %v1262_v31 }
  0x74   : > { %847 = vmatpush.bf16.msrb.mxu1 %v1326_v53 }
  0x75   : > { %861 = vmatpush.bf16.msrb.mxu2 %v1266_v35 }
  0x76   : > { %875 = vmatpush.bf16.msrb.mxu3 %v1330_v55 }
  0x77   : > { %834 = vmatpush.bf16.msrb.mxu0 %v1254_v47 }
  0x78   : > { %848 = vmatpush.bf16.msrb.mxu1 %v1318_v1 }
  0x79   : > { %862 = vmatpush.bf16.msrb.mxu2 %v1258_v49 }
  0x7a   : > { %876 = vmatpush.bf16.msrb.mxu3 %v1322_v3 }
  0x7b   : > { %835 = vmatpush.bf16.msrb.mxu0 %v1246_v59 }
  0x7c   : > { %849 = vmatpush.bf16.msrb.mxu1 %v1310_v7 }
  0x7d   : > { %863 = vmatpush.bf16.msrb.mxu2 %v1250_v61 }
  0x7e   : > { %877 = vmatpush.bf16.msrb.mxu3 %v1314_v9 }
  0xdb   : > { %v577_v11 = vpop.f32.mrf.mxu0 }
  0xdc   : > { %v591_v13 = vpop.f32.mrf.mxu1  ;;  %v578_v14 = vadd.f32 %v577_v11, %v404_v12 }
  0xde   : > { %v592_v19 = vadd.f32 %v591_v13, %v578_v14 }
  0xe0   : > { %v624_v24 = vmax.f32 %v592_v19, 0.0 }
  0xe3   : > { %v605_v15 = vpop.f32.mrf.mxu2  ;;  %v579_v18 = vpop.f32.mrf.mxu0 }
  0xe4   : > { %v619_v17 = vpop.f32.mrf.mxu3  ;;  %v580_v20 = vadd.f32 %v579_v18, %v404_v12  ;;  %v593_v21 = vpop.f32.mrf.mxu1  ;;  %v606_v23 = vadd.f32 %v605_v15, %v405_v16 }
  0xe6   : > { %v594_v22 = vadd.f32 %v593_v21, %v580_v20  ;;  %v620_v29 = vadd.f32 %v619_v17, %v606_v23 }
  0xe8   : > { %v626_v25 = vmax.f32 %v594_v22, 0.0  ;;  %v625_v34 = vmax.f32 %v620_v29, 0.0 }
  0xea   : > { %v628_v26 = vpack.c.bf16 %v626_v25, %v624_v24 }
  0xeb   : > { %v607_v27 = vpop.f32.mrf.mxu2 }
  0xec   : > { %v608_v30 = vadd.f32 %v607_v27, %v405_v16  ;;  %v621_v31 = vpop.f32.mrf.mxu3  ;;  %836 = vmatmul.bf16.vlgmr.msrb.gmra.mxu0 %v628_v26  ;;  %864 = vmatmul.bf16.vlgmr.msrb.gmra.mxu2 %v628_v26  ;;  %v945_v27 = vld [vmem:[%s2022_s5] sm:$0x3] }
  0xee   : > { %v622_v33 = vadd.f32 %v621_v31, %v608_v30  ;;  %v955_v31 = vld [vmem:[#allocation10] sm:$0x3] }
  0xf0   : > { %v627_v35 = vmax.f32 %v622_v33, 0.0 }
  0xf2   : > { %v629_v36 = vpack.c.bf16 %v627_v35, %v625_v34  ;;  %v947_v35 = vperm.slane %v945_v27, 0 }
  0xf4   : > { %850 = vmatmul.bf16.vlgmr.msrb.gmra.mxu1 %v629_v36  ;;  %878 = vmatmul.bf16.vlgmr.msrb.gmra.mxu3 %v629_v36  ;;  %v948_v36 = vperm.slane %v945_v27, 1 }
 0x169   : > { %v837_v40 = vpop.f32.mrf.mxu0 }
 0x16a   : > { %v838_v45 = vadd.f32 %v837_v40, %v664_v41 }
 0x16f   : > { %v865_v43 = vpop.f32.mrf.mxu2 }
 0x170   : > { %v866_v47 = vadd.f32 %v865_v43, %v665_v44 }
 0x171   : > { %v851_v42 = vpop.f32.mrf.mxu1  ;;  %v839_v50 = vpop.f32.mrf.mxu0 }
 0x172   : > { %v852_v46 = vadd.f32 %v851_v42, %v838_v45  ;;  %v840_v55 = vadd.f32 %v839_v50, %v664_v41  ;;  %v957_v41 = vperm.slane %v955_v31, 0  ;;  %v958_v42 = vperm.slane %v955_v31, 1 }
 0x174   : > { %v884_v51 = vadd.f32 %v852_v46, %v1957_v28  ;;  %v1540_v28 = vpop.eup %1539 }
 0x175   : > { %v895_v1 = vmul.f32 256.0, %v1540_v28  ;;  %vm899_vm0 = vweird.f32 %v1540_v28 }
 0x177   : > { %v879_v48 = vpop.f32.mrf.mxu3  ;;  %v867_v54 = vpop.f32.mrf.mxu2 }
 0x178   : > { %v880_v49 = vadd.f32 %v879_v48, %v866_v47  ;;  %v868_v58 = vadd.f32 %v867_v54, %v665_v44 }
 0x179   : > { %v853_v53 = vpop.f32.mrf.mxu1 }
 0x17a   : > { %v885_v52 = vadd.f32 %v880_v49, %v1963_v37  ;;  %v854_v57 = vadd.f32 %v853_v53, %v840_v55  ;;  %v896_v37 = vsub.f32 1.0, %v895_v1 }
 0x17c   : > { %v888_v56 = vadd.f32 %v885_v52, %v884_v51  ;;  %v886_v61 = vadd.f32 %v854_v57, %v1960_v32  ;;  %v897_v2 = vmul.f32 %v1540_v28, %v896_v37 }
 0x17e   : > { %889 = vadd.xlane.f32.xlu0 %v888_v56  ;;  %v898_v3 = vadd.f32 %v1540_v28, %v897_v2 }
 0x17f   : > { %v881_v59 = vpop.f32.mrf.mxu3 }
 0x180   : > { %v882_v60 = vadd.f32 %v881_v59, %v868_v58  ;;  %v900_v4 = vsel %vm899_vm0, %v1540_v28, %v898_v3 }
 0x182   : > { %v887_v62 = vadd.f32 %v882_v60, %v1966_v38 }
 0x184   : > { %v891_v63 = vadd.f32 %v887_v62, %v886_v61 }
 0x186   : > { %892 = vadd.xlane.f32.xlu0 %v891_v63 }
 0x1f1   : > { %v890_v5 = vpop.xlane.xlu0 %889 }
 0x1f2   : > { %v901_v6 = vmul.f32 %v900_v4, %v890_v5 }
 0x1f4   : > { %v903_v7 = vsub.f32 %v884_v51, %v901_v6  ;;  %v904_v8 = vsub.f32 %v885_v52, %v901_v6 }
 0x1f6   : > { %v907_v9 = vmul.f32 %v903_v7, %v903_v7  ;;  %v908_v10 = vmul.f32 %v904_v8, %v904_v8 }
 0x1f8   : > { %v911_v32 = vadd.f32 %v908_v10, %v907_v9 }
 0x1f9   : > { %v893_v11 = vpop.xlane.xlu0 %892 }
 0x1fa   : > { %v902_v38 = vmul.f32 %v900_v4, %v893_v11  ;;  %912 = vadd.xlane.f32.xlu1 %v911_v32 }
 0x1fc   : > { %v905_v12 = vsub.f32 %v886_v61, %v902_v38  ;;  %v906_v13 = vsub.f32 %v887_v62, %v902_v38 }
 0x1fe   : > { %v909_v14 = vmul.f32 %v905_v12, %v905_v12  ;;  %v910_v15 = vmul.f32 %v906_v13, %v906_v13 }
 0x200   : > { %v914_v16 = vadd.f32 %v910_v15, %v909_v14 }
 0x202   : > { %915 = vadd.xlane.f32.xlu1 %v914_v16 }
 0x26d   : > { %v913_v17 = vpop.xlane.xlu1 %912 }
 0x26e   : > { %v917_v18 = vmul.f32 %v913_v17, %v900_v4 }
 0x270   : > { %v919_v19 = vadd.f32 1e-05, %v917_v18 }
 0x272   : > { %1541 = vrsqrt.f32 %v919_v19  ;;  %vm927_vm2 = vweird.f32 %v919_v19 }
 0x275   : > { %v916_v20 = vpop.xlane.xlu1 %915 }
 0x276   : > { %v918_v21 = vmul.f32 %v916_v20, %v900_v4 }
 0x278   : > { %v1542_v22 = vpop.eup %1541  ;;  %v920_v23 = vadd.f32 1e-05, %v918_v21 }
 0x279   : > { %v922_v24 = vmul.f32 %v1542_v22, %v919_v19  ;;  %vm928_vm1 = vweird.f32 %v1542_v22 }
 0x27a   : > { %1543 = vrsqrt.f32 %v920_v23  ;;  %vm929_vm3 = vmor %vm927_vm2, %vm928_vm1  ;;  %vm937_vm5 = vweird.f32 %v920_v23 }
 0x27b   : > { %v923_v25 = vmul.f32 %v1542_v22, %v922_v24 }
 0x27d   : > { %v924_v26 = vmul.f32 0.5, %v923_v25 }
 0x27f   : > { %v925_v29 = vsub.f32 1.5, %v924_v26 }
 0x280   : > { %v1544_v30 = vpop.eup %1543 }
 0x281   : > { %v926_v33 = vmul.f32 %v1542_v22, %v925_v29  ;;  %v932_v34 = vmul.f32 %v1544_v30, %v920_v23  ;;  %vm938_vm4 = vweird.f32 %v1544_v30 }
 0x282   : > { %vm939_vm6 = vmor %vm937_vm5, %vm938_vm4 }
 0x283   : > { %v930_v39 = vsel %vm929_vm3, %v1542_v22, %v926_v33  ;;  %v933_v40 = vmul.f32 %v1544_v30, %v932_v34 }
 0x284   : > { %v941_v43 = vmul.f32 %v930_v39, %v903_v7  ;;  %v942_v44 = vmul.f32 %v930_v39, %v904_v8 }
 0x285   : > { %v934_v45 = vmul.f32 0.5, %v933_v40 }
 0x286   : > { %v951_v46 = vmul.f32 %v947_v35, %v941_v43  ;;  %v952_v47 = vmul.f32 %v948_v36, %v942_v44 }
 0x287   : > { %v935_v48 = vsub.f32 1.5, %v934_v45 }
 0x288   : > { %v961_v49 = vadd.f32 %v957_v41, %v951_v46  ;;  %v962_v50 = vadd.f32 %v958_v42, %v952_v47 }
 0x289   : > { %v936_v51 = vmul.f32 %v1544_v30, %v935_v48 }
 0x28a   : > { %965 = vst [vmem:[%s361_s19] sm:$0xff] %v961_v49 }
 0x28b   : > { %966 = vst [vmem:[%s361_s19 + $0x8] sm:$0xff] %v962_v50  ;;  %v940_v52 = vsel %vm939_vm6, %v1544_v30, %v936_v51 }
 0x28c   : > { %v943_v53 = vmul.f32 %v940_v52, %v905_v12  ;;  %v944_v54 = vmul.f32 %v940_v52, %v906_v13 }
 0x28e   : > { %v953_v55 = vmul.f32 %v947_v35, %v943_v53  ;;  %v954_v56 = vmul.f32 %v948_v36, %v944_v54 }
 0x290   : > { %v963_v57 = vadd.f32 %v957_v41, %v953_v55  ;;  %v964_v58 = vadd.f32 %v958_v42, %v954_v56 }
 0x292   : > { %967 = vst [vmem:[%s361_s19 + $0x10] sm:$0xff] %v963_v57 }
 0x293   : > { %968 = vst [vmem:[%s361_s19 + $0x18] sm:$0xff] %v964_v58 }
 0x294   : > { %1722 = shalt.err (!%p1719_p10)
}
 0x295   : > { %s1780_s9 = smov 256   ;;  %s1781_s21 = smov 16  }
 0x296   : > { %1463 = dma.vmem_to_hbm [thread:$0]  (%p1906_p3), %s984_s29, 512, %s986_s28, %s970_s14, %s1780_s9, %s1780_s9, %s1781_s21  }
 0x297 PF: > { %s1000_s19 = sand.u32 1, %s1757_s24   ;;  %p2033_p12 = scmp.ge.s32.totalorder %s1769_s27, 2 }
 0x298   : > { %s1001_s10 = scalar_lea.sflag [#allocation4], %s1000_s19 }
 0x299   : > { %p1483_p13 = pnand %p2033_p12, %p1857_p6 }
 0x29b   : > { %p1484_p0 = pneg %p1483_p13 }
 0x29d   : > { %1752 = dma.done.wait (%p1484_p0), %s1001_s10, 512  }
 0x29e   : > { %1754 = vsyncadd (%p1484_p0), %s1001_s10, 4294966784  ;;  %p22_p5 = scmp.ge.s32.totalorder %s1896_s18, 4   ;;  %s2034_s24 = smov %s1761_s25 }
 0x29f   : > { %s2035_s25 = smov %s1765_s26  ;;  %s2036_s26 = smov %s1912_s23 }
 0x2a0   : > { %s2037_s27 = smov %s1896_s18  ;;  %24 = sbr.rel (!%p22_p5) target bundleno = 9 (0x9), region = 109 }
 0x2a5   :  { %1007 = vsyncpa [#allocation3], 1 }
 0x2a6   :  { %1009 = vsyncpa [#allocation3 + $0x1], 1 }
 0x2a7   :  { %1010 = vsyncpa [#allocation6], 1 }
 0x2a8   :  { %1011 = vsyncpa [#allocation9], 1 }
 0x2a9   :  { %1012 = vsyncpa [#allocation4], 1 }
 0x2aa   :  { %1014 = vsyncpa [#allocation4 + $0x1], 1 }

</bundles_post_ra>
